<compile_context>
chip_gen: v7x
topology: tpu7x:2x2x1
jax: 0.10.0
libtpu: 0.0.40
codegen_flags: <defaults>
</compile_context>

<pallas_src>
import jax
import jax.numpy as jnp
from jax.experimental import pallas as pl
from jax.experimental.pallas import tpu as pltpu


# ----------------------------------------------------------------------------
# Pallas kernel 1: one bidirectional GRU layer (fwd + bwd fused).
# ----------------------------------------------------------------------------
def _make_gru_layer_kernel(T, B, H):
    def kernel(x_ref,                                   # (T*B, D_in)
               wif_ref, whf_ref, bif_ref, bhf_ref,      # forward params
               wib_ref, whb_ref, bib_ref, bhb_ref,      # backward params
               out_ref,                                 # (T, B, 2H)
               gxf_scr, gxb_scr, hf_scr, hb_scr):
        # Precompute input projections for all timesteps with two big matmuls
        # (MXU-friendly: T*B rows instead of B rows per step).
        x = x_ref[...]
        gxf_scr[...] = jnp.dot(x, wif_ref[...],
                               preferred_element_type=jnp.float32) + bif_ref[...]
        gxb_scr[...] = jnp.dot(x, wib_ref[...],
                               preferred_element_type=jnp.float32) + bib_ref[...]
        hf_scr[...] = jnp.zeros_like(hf_scr)
        hb_scr[...] = jnp.zeros_like(hb_scr)

        def gru_cell(gx, gh, h):
            r = jax.nn.sigmoid(gx[:, :H] + gh[:, :H])
            z = jax.nn.sigmoid(gx[:, H:2 * H] + gh[:, H:2 * H])
            n = jnp.tanh(gx[:, 2 * H:] + r * gh[:, 2 * H:])
            return (1.0 - z) * n + z * h

        def step(i, carry):
            tf = i                 # forward time index
            tb = T - 1 - i         # backward time index
            hf = hf_scr[...]
            hb = hb_scr[...]
            gxf = gxf_scr[pl.ds(pl.multiple_of(tf * B, B), B), :]
            gxb = gxb_scr[pl.ds(pl.multiple_of(tb * B, B), B), :]
            ghf = jnp.dot(hf, whf_ref[...],
                          preferred_element_type=jnp.float32) + bhf_ref[...]
            ghb = jnp.dot(hb, whb_ref[...],
                          preferred_element_type=jnp.float32) + bhb_ref[...]
            hf_new = gru_cell(gxf, ghf, hf)
            hb_new = gru_cell(gxb, ghb, hb)
            hf_scr[...] = hf_new
            hb_scr[...] = hb_new
            out_ref[tf, :, :H] = hf_new     # forward half of the feature dim
            out_ref[tb, :, H:] = hb_new     # backward half of the feature dim
            return carry

        jax.lax.fori_loop(0, T, step, 0)

    return kernel


def gru_layer_pallas(x_tbd, fwd_params, bwd_params):
    """One bidirectional GRU layer.  x_tbd: (T, B, D_in) -> (T, B, 2H)."""
    T, B, D = x_tbd.shape
    H = fwd_params[1].shape[0]
    x_flat = x_tbd.reshape(T * B, D)        # contiguous, free reshape in XLA
    kernel = _make_gru_layer_kernel(T, B, H)
    vmem = pl.BlockSpec(memory_space=pltpu.MemorySpace.VMEM)
    # TODO(synk): for very large T*B the gx scratch would need K-tiling of the
    # precompute; fine at these (and typical) sizes.
    return pl.pallas_call(
        kernel,
        out_shape=jax.ShapeDtypeStruct((T, B, 2 * H), jnp.float32),
        in_specs=[vmem] * 9,
        out_specs=vmem,
        scratch_shapes=[
            pltpu.VMEM((T * B, 3 * H), jnp.float32),   # gx forward
            pltpu.VMEM((T * B, 3 * H), jnp.float32),   # gx backward
            pltpu.VMEM((B, H), jnp.float32),           # h forward
            pltpu.VMEM((B, H), jnp.float32),           # h backward
        ],
    )(x_flat, *fwd_params, *bwd_params)


# ----------------------------------------------------------------------------
# Pallas kernel 2: attention pooling + output linear (time-major input).
#   M = tanh(op) @ w ; M = M * pad ; alpha = softmax(M over T)
#   out = (sum_t op * alpha) @ lin_w + lin_b
# ----------------------------------------------------------------------------
def attn_lin_kernel(op_ref, pad_ref, w_ref, lw_ref, lb_ref, out_ref):
    op = op_ref[...]                                      # (T, B, D2)
    m = jnp.tanh(op)
    w_row = w_ref[...]                                    # (1, D2)
    scores = jnp.sum(m * w_row[None, :, :], axis=-1)      # (T, B)
    scores = scores * pad_ref[...]                        # (T, B)
    scores = scores - jnp.max(scores, axis=0, keepdims=True)
    e = jnp.exp(scores)
    alpha = e * pl.reciprocal(jnp.sum(e, axis=0, keepdims=True), approx=False)
    ctx = jnp.sum(op * alpha[:, :, None], axis=0)         # (B, D2)
    out_ref[...] = jnp.dot(ctx, lw_ref[...],
                           preferred_element_type=jnp.float32) + lb_ref[...]


def attn_lin_pallas(op_tbd, pad_tb, w_row, lin_w, lin_b):
    _, B, _ = op_tbd.shape
    O = lin_w.shape[1]
    vmem = pl.BlockSpec(memory_space=pltpu.MemorySpace.VMEM)
    return pl.pallas_call(
        attn_lin_kernel,
        out_shape=jax.ShapeDtypeStruct((B, O), jnp.float32),
        in_specs=[vmem] * 5,
        out_specs=vmem,
    )(op_tbd, pad_tb, w_row, lin_w, lin_b)


# ----------------------------------------------------------------------------
# Full GRU_Attention forward (glue in plain JAX, hot paths in Pallas).
# ----------------------------------------------------------------------------
def gru_attention_forward(x_btd, pad_list, params):
    # x_btd: (B, T, input_dim), pad_list: (B, T)
    x_tbd = jnp.transpose(x_btd, (1, 0, 2)).astype(jnp.float32)   # time-major
    layer_in = x_tbd
    for layer in params["layers"]:
        layer_in = gru_layer_pallas(layer_in, layer["fwd"], layer["bwd"])
        # TODO(synk): inter-layer dropout omitted (eval mode / dropout_rate=0).
    pad_tb = jnp.transpose(pad_list.astype(jnp.float32))          # (T, B)
    w_row = jnp.transpose(params["w"])                            # (1, D2)
    return attn_lin_pallas(layer_in, pad_tb, w_row,
                           params["lin_w"], params["lin_b"])


# ----------------------------------------------------------------------------
# Pure-JAX reference (for validation).
# ----------------------------------------------------------------------------
def _gru_dir_ref(x_tbd, w_ih, w_hh, b_ih, b_hh, reverse):
    T, B, _ = x_tbd.shape
    H = w_hh.shape[0]
    h = jnp.zeros((B, H), jnp.float32)
    outs = [None] * T
    order = range(T - 1, -1, -1) if reverse else range(T)
    for t in order:
        gx = x_tbd[t] @ w_ih + b_ih
        gh = h @ w_hh + b_hh
        r = jax.nn.sigmoid(gx[:, :H] + gh[:, :H])
        z = jax.nn.sigmoid(gx[:, H:2 * H] + gh[:, H:2 * H])
        n = jnp.tanh(gx[:, 2 * H:] + r * gh[:, 2 * H:])
        h = (1.0 - z) * n + z * h
        outs[t] = h
    return jnp.stack(outs, axis=0)


def gru_attention_ref(x_btd, pad_list, params):
    x_tbd = jnp.transpose(x_btd, (1, 0, 2)).astype(jnp.float32)
    layer_in = x_tbd
    for layer in params["layers"]:
        fwd = _gru_dir_ref(layer_in, *layer["fwd"], reverse=False)
        bwd = _gru_dir_ref(layer_in, *layer["bwd"], reverse=True)
        layer_in = jnp.concatenate([fwd, bwd], axis=-1)
    op = jnp.transpose(layer_in, (1, 0, 2))                       # (B, T, 2H)
    M = jnp.tanh(op)
    M = jnp.squeeze(M @ params["w"], axis=2)
    M = M * pad_list
    alpha = jax.nn.softmax(M, axis=1)[:, :, None]
    ctx = jnp.sum(op * alpha, axis=1)
    return ctx @ params["lin_w"] + params["lin_b"]


# ----------------------------------------------------------------------------
# Deterministic parameter construction (synthetic, no checkpoint).
# ----------------------------------------------------------------------------
def make_params(key, input_dim, hidden_dim, num_layers, output_dim):
    def u(k, shape, scale):
        return jax.random.uniform(k, shape, jnp.float32, -scale, scale)

    scale = 1.0 / jnp.sqrt(hidden_dim)
    layers = []
    for l in range(num_layers):
        d_in = input_dim if l == 0 else 2 * hidden_dim
        dir_params = []
        for _ in range(2):  # forward, backward
            key, k1, k2, k3, k4 = jax.random.split(key, 5)
            dir_params.append((
                u(k1, (d_in, 3 * hidden_dim), scale),        # w_ih (transposed)
                u(k2, (hidden_dim, 3 * hidden_dim), scale),  # w_hh (transposed)
                u(k3, (1, 3 * hidden_dim), scale),           # b_ih
                u(k4, (1, 3 * hidden_dim), scale),           # b_hh
            ))
        layers.append({"fwd": dir_params[0], "bwd": dir_params[1]})

    key, kw, klw, klb = jax.random.split(key, 4)
    d2 = 2 * hidden_dim
    # nn.Parameter(torch.zeros(...)) in the module; use random values here so
    # the attention path is exercised non-trivially (synthetic init).
    w = jax.random.normal(kw, (d2, 1), jnp.float32) * 0.1
    lin_scale = 1.0 / jnp.sqrt(d2)
    lin_w = u(klw, (d2, output_dim), lin_scale)
    lin_b = u(klb, (1, output_dim), lin_scale)
    return {"layers": layers, "w": w, "lin_w": lin_w, "lin_b": lin_b}


if __name__ == "__main__":
    B, T, INPUT_DIM, HIDDEN, NUM_LAYERS, OUTPUT_DIM = 2, 8, 16, 32, 2, 4

    key = jax.random.PRNGKey(0)
    key, kx, kp = jax.random.split(key, 3)
    x = jax.random.normal(kx, (B, T, INPUT_DIM), jnp.float32)
    # pad mask: 1.0 for valid positions, 0.0 for padded tail
    lengths = jnp.array([T, T - 3])
    pad_list = (jnp.arange(T)[None, :] < lengths[:, None]).astype(jnp.float32)

    params = make_params(key, INPUT_DIM, HIDDEN, NUM_LAYERS, OUTPUT_DIM)

    out = jax.block_until_ready(gru_attention_forward(x, pad_list, params))
    ref = jax.block_until_ready(gru_attention_ref(x, pad_list, params))

    assert out.shape == (B, OUTPUT_DIM)
    assert jnp.allclose(out, ref, atol=1e-4, rtol=1e-4), (out, ref)
    print("KERNEL_OK")
</pallas_src>

<mosaic_0001>
module attributes {stable_mosaic.version = 11 : i64} {
  func.func @kernel(%arg0: memref<16x16xf32, #tpu.memory_space<vmem>>, %arg1: memref<16x96xf32, #tpu.memory_space<vmem>>, %arg2: memref<32x96xf32, #tpu.memory_space<vmem>>, %arg3: memref<1x96xf32, #tpu.memory_space<vmem>>, %arg4: memref<1x96xf32, #tpu.memory_space<vmem>>, %arg5: memref<16x96xf32, #tpu.memory_space<vmem>>, %arg6: memref<32x96xf32, #tpu.memory_space<vmem>>, %arg7: memref<1x96xf32, #tpu.memory_space<vmem>>, %arg8: memref<1x96xf32, #tpu.memory_space<vmem>>, %arg9: memref<8x2x64xf32, #tpu.memory_space<vmem>>, %arg10: memref<16x96xf32, #tpu.memory_space<vmem>>, %arg11: memref<16x96xf32, #tpu.memory_space<vmem>>, %arg12: memref<2x32xf32, #tpu.memory_space<vmem>>, %arg13: memref<2x32xf32, #tpu.memory_space<vmem>>) attributes {dimension_semantics = [], scalar_prefetch = 0 : i64, scratch_operands = 4 : i64, tpu.core_type = #tpu.core_type<tc>} {
    %c0 = arith.constant 0 : index
    %c0_0 = arith.constant 0 : index
    %0 = vector.load %arg0[%c0, %c0_0] : memref<16x16xf32, #tpu.memory_space<vmem>>, vector<16x16xf32>
    %c0_1 = arith.constant 0 : index
    %c0_2 = arith.constant 0 : index
    %1 = vector.load %arg1[%c0_1, %c0_2] : memref<16x96xf32, #tpu.memory_space<vmem>>, vector<16x96xf32>
    %cst = arith.constant dense<0.000000e+00> : vector<16x96xf32>
    %2 = tpu.matmul %0, %1, %cst {dimension_numbers = #tpu.dot_dimension_numbers<[1], [0], [0], [1], [0, 0, 1, 1], [], []>} : vector<16x16xf32>, vector<16x96xf32>, vector<16x96xf32> -> vector<16x96xf32>
    %c0_3 = arith.constant 0 : index
    %c0_4 = arith.constant 0 : index
    %3 = vector.load %arg3[%c0_3, %c0_4] : memref<1x96xf32, #tpu.memory_space<vmem>>, vector<1x96xf32>
    %4 = vector.broadcast %3 : vector<1x96xf32> to vector<16x96xf32>
    %5 = arith.addf %2, %4 : vector<16x96xf32>
    %c0_5 = arith.constant 0 : index
    %c0_6 = arith.constant 0 : index
    %6 = vector.load %arg10[%c0_5, %c0_6] : memref<16x96xf32, #tpu.memory_space<vmem>>, vector<16x96xf32>
    tpu.vector_store %arg10[%c0_5, %c0_6], %5 {strides = array<i32>} : memref<16x96xf32, #tpu.memory_space<vmem>>, vector<16x96xf32>,
    %c0_7 = arith.constant 0 : index
    %c0_8 = arith.constant 0 : index
    %7 = vector.load %arg5[%c0_7, %c0_8] : memref<16x96xf32, #tpu.memory_space<vmem>>, vector<16x96xf32>
    %cst_9 = arith.constant dense<0.000000e+00> : vector<16x96xf32>
    %8 = tpu.matmul %0, %7, %cst_9 {dimension_numbers = #tpu.dot_dimension_numbers<[1], [0], [0], [1], [0, 0, 1, 1], [], []>} : vector<16x16xf32>, vector<16x96xf32>, vector<16x96xf32> -> vector<16x96xf32>
    %c0_10 = arith.constant 0 : index
    %c0_11 = arith.constant 0 : index
    %9 = vector.load %arg7[%c0_10, %c0_11] : memref<1x96xf32, #tpu.memory_space<vmem>>, vector<1x96xf32>
    %10 = vector.broadcast %9 : vector<1x96xf32> to vector<16x96xf32>
    %11 = arith.addf %8, %10 : vector<16x96xf32>
    %c0_12 = arith.constant 0 : index
    %c0_13 = arith.constant 0 : index
    %12 = vector.load %arg11[%c0_12, %c0_13] : memref<16x96xf32, #tpu.memory_space<vmem>>, vector<16x96xf32>
    tpu.vector_store %arg11[%c0_12, %c0_13], %11 {strides = array<i32>} : memref<16x96xf32, #tpu.memory_space<vmem>>, vector<16x96xf32>,
    %cst_14 = arith.constant 0.000000e+00 : f32
    %13 = vector.broadcast %cst_14 : f32 to vector<2x32xf32>
    %c0_15 = arith.constant 0 : index
    %c0_16 = arith.constant 0 : index
    %14 = vector.load %arg12[%c0_15, %c0_16] : memref<2x32xf32, #tpu.memory_space<vmem>>, vector<2x32xf32>
    tpu.vector_store %arg12[%c0_15, %c0_16], %13 {strides = array<i32>} : memref<2x32xf32, #tpu.memory_space<vmem>>, vector<2x32xf32>,
    %cst_17 = arith.constant 0.000000e+00 : f32
    %15 = vector.broadcast %cst_17 : f32 to vector<2x32xf32>
    %c0_18 = arith.constant 0 : index
    %c0_19 = arith.constant 0 : index
    %16 = vector.load %arg13[%c0_18, %c0_19] : memref<2x32xf32, #tpu.memory_space<vmem>>, vector<2x32xf32>
    tpu.vector_store %arg13[%c0_18, %c0_19], %15 {strides = array<i32>} : memref<2x32xf32, #tpu.memory_space<vmem>>, vector<2x32xf32>,
    %c0_i32 = arith.constant 0 : i32
    %c8_i32 = arith.constant 8 : i32
    %17 = arith.addi %c0_i32, %c8_i32 : i32
    %c1_i32 = arith.constant 1 : i32
    scf.for %arg14 = %c0_i32 to %17 step %c1_i32  : i32 {
      %c7_i32 = arith.constant 7 : i32
      %18 = arith.subi %c7_i32, %arg14 : i32
      %c0_21 = arith.constant 0 : index
      %c0_22 = arith.constant 0 : index
      %19 = vector.load %arg12[%c0_21, %c0_22] : memref<2x32xf32, #tpu.memory_space<vmem>>, vector<2x32xf32>
      %c0_23 = arith.constant 0 : index
      %c0_24 = arith.constant 0 : index
      %20 = vector.load %arg13[%c0_23, %c0_24] : memref<2x32xf32, #tpu.memory_space<vmem>>, vector<2x32xf32>
      %c2_i32 = arith.constant 2 : i32
      %21 = arith.muli %arg14, %c2_i32 : i32
      %22 = tpu.assume_multiple %21, 2 : i32
      %23 = arith.index_cast %22 : i32 to index
      %c0_25 = arith.constant 0 : index
      %24 = vector.load %arg10[%23, %c0_25] : memref<16x96xf32, #tpu.memory_space<vmem>>, vector<2x96xf32>
      %c2_i32_26 = arith.constant 2 : i32
      %25 = arith.muli %18, %c2_i32_26 : i32
      %26 = tpu.assume_multiple %25, 2 : i32
      %27 = arith.index_cast %26 : i32 to index
      %c0_27 = arith.constant 0 : index
      %28 = vector.load %arg11[%27, %c0_27] : memref<16x96xf32, #tpu.memory_space<vmem>>, vector<2x96xf32>
      %c0_28 = arith.constant 0 : index
      %c0_29 = arith.constant 0 : index
      %29 = vector.load %arg2[%c0_28, %c0_29] : memref<32x96xf32, #tpu.memory_space<vmem>>, vector<32x96xf32>
      %cst_30 = arith.constant dense<0.000000e+00> : vector<2x96xf32>
      %30 = tpu.matmul %19, %29, %cst_30 {dimension_numbers = #tpu.dot_dimension_numbers<[1], [0], [0], [1], [0, 0, 1, 1], [], []>} : vector<2x32xf32>, vector<32x96xf32>, vector<2x96xf32> -> vector<2x96xf32>
      %c0_31 = arith.constant 0 : index
      %c0_32 = arith.constant 0 : index
      %31 = vector.load %arg4[%c0_31, %c0_32] : memref<1x96xf32, #tpu.memory_space<vmem>>, vector<1x96xf32>
      %32 = vector.broadcast %31 : vector<1x96xf32> to vector<2x96xf32>
      %33 = arith.addf %30, %32 : vector<2x96xf32>
      %c0_33 = arith.constant 0 : index
      %c0_34 = arith.constant 0 : index
      %34 = vector.load %arg6[%c0_33, %c0_34] : memref<32x96xf32, #tpu.memory_space<vmem>>, vector<32x96xf32>
      %cst_35 = arith.constant dense<0.000000e+00> : vector<2x96xf32>
      %35 = tpu.matmul %20, %34, %cst_35 {dimension_numbers = #tpu.dot_dimension_numbers<[1], [0], [0], [1], [0, 0, 1, 1], [], []>} : vector<2x32xf32>, vector<32x96xf32>, vector<2x96xf32> -> vector<2x96xf32>
      %c0_36 = arith.constant 0 : index
      %c0_37 = arith.constant 0 : index
      %36 = vector.load %arg8[%c0_36, %c0_37] : memref<1x96xf32, #tpu.memory_space<vmem>>, vector<1x96xf32>
      %37 = vector.broadcast %36 : vector<1x96xf32> to vector<2x96xf32>
      %38 = arith.addf %35, %37 : vector<2x96xf32>
      %39 = vector.extract_strided_slice %24 {offsets = [0, 0], sizes = [2, 32], strides = [1, 1]} : vector<2x96xf32> to vector<2x32xf32>
      %40 = vector.extract_strided_slice %33 {offsets = [0, 0], sizes = [2, 32], strides = [1, 1]} : vector<2x96xf32> to vector<2x32xf32>
      %41 = arith.addf %39, %40 : vector<2x32xf32>
      %42 = arith.negf %41 : vector<2x32xf32>
      %43 = math.exp %42 : vector<2x32xf32>
      %cst_38 = arith.constant 1.000000e+00 : f32
      %44 = vector.broadcast %cst_38 : f32 to vector<2x32xf32>
      %45 = arith.addf %44, %43 : vector<2x32xf32>
      %46 = arith.divf %44, %45 : vector<2x32xf32>
      %47 = vector.extract_strided_slice %24 {offsets = [0, 32], sizes = [2, 32], strides = [1, 1]} : vector<2x96xf32> to vector<2x32xf32>
      %48 = vector.extract_strided_slice %33 {offsets = [0, 32], sizes = [2, 32], strides = [1, 1]} : vector<2x96xf32> to vector<2x32xf32>
      %49 = arith.addf %47, %48 : vector<2x32xf32>
      %50 = arith.negf %49 : vector<2x32xf32>
      %51 = math.exp %50 : vector<2x32xf32>
      %cst_39 = arith.constant 1.000000e+00 : f32
      %52 = vector.broadcast %cst_39 : f32 to vector<2x32xf32>
      %53 = arith.addf %52, %51 : vector<2x32xf32>
      %54 = arith.divf %52, %53 : vector<2x32xf32>
      %55 = vector.extract_strided_slice %24 {offsets = [0, 64], sizes = [2, 32], strides = [1, 1]} : vector<2x96xf32> to vector<2x32xf32>
      %56 = vector.extract_strided_slice %33 {offsets = [0, 64], sizes = [2, 32], strides = [1, 1]} : vector<2x96xf32> to vector<2x32xf32>
      %57 = arith.mulf %46, %56 : vector<2x32xf32>
      %58 = arith.addf %55, %57 : vector<2x32xf32>
      %59 = math.tanh %58 : vector<2x32xf32>
      %cst_40 = arith.constant 1.000000e+00 : f32
      %60 = vector.broadcast %cst_40 : f32 to vector<2x32xf32>
      %61 = arith.subf %60, %54 : vector<2x32xf32>
      %62 = arith.mulf %61, %59 : vector<2x32xf32>
      %63 = arith.mulf %54, %19 : vector<2x32xf32>
      %64 = arith.addf %62, %63 : vector<2x32xf32>
      %65 = vector.extract_strided_slice %28 {offsets = [0, 0], sizes = [2, 32], strides = [1, 1]} : vector<2x96xf32> to vector<2x32xf32>
      %66 = vector.extract_strided_slice %38 {offsets = [0, 0], sizes = [2, 32], strides = [1, 1]} : vector<2x96xf32> to vector<2x32xf32>
      %67 = arith.addf %65, %66 : vector<2x32xf32>
      %68 = arith.negf %67 : vector<2x32xf32>
      %69 = math.exp %68 : vector<2x32xf32>
      %cst_41 = arith.constant 1.000000e+00 : f32
      %70 = vector.broadcast %cst_41 : f32 to vector<2x32xf32>
      %71 = arith.addf %70, %69 : vector<2x32xf32>
      %72 = arith.divf %70, %71 : vector<2x32xf32>
      %73 = vector.extract_strided_slice %28 {offsets = [0, 32], sizes = [2, 32], strides = [1, 1]} : vector<2x96xf32> to vector<2x32xf32>
      %74 = vector.extract_strided_slice %38 {offsets = [0, 32], sizes = [2, 32], strides = [1, 1]} : vector<2x96xf32> to vector<2x32xf32>
      %75 = arith.addf %73, %74 : vector<2x32xf32>
      %76 = arith.negf %75 : vector<2x32xf32>
      %77 = math.exp %76 : vector<2x32xf32>
      %cst_42 = arith.constant 1.000000e+00 : f32
      %78 = vector.broadcast %cst_42 : f32 to vector<2x32xf32>
      %79 = arith.addf %78, %77 : vector<2x32xf32>
      %80 = arith.divf %78, %79 : vector<2x32xf32>
      %81 = vector.extract_strided_slice %28 {offsets = [0, 64], sizes = [2, 32], strides = [1, 1]} : vector<2x96xf32> to vector<2x32xf32>
      %82 = vector.extract_strided_slice %38 {offsets = [0, 64], sizes = [2, 32], strides = [1, 1]} : vector<2x96xf32> to vector<2x32xf32>
      %83 = arith.mulf %72, %82 : vector<2x32xf32>
      %84 = arith.addf %81, %83 : vector<2x32xf32>
      %85 = math.tanh %84 : vector<2x32xf32>
      %cst_43 = arith.constant 1.000000e+00 : f32
      %86 = vector.broadcast %cst_43 : f32 to vector<2x32xf32>
      %87 = arith.subf %86, %80 : vector<2x32xf32>
      %88 = arith.mulf %87, %85 : vector<2x32xf32>
      %89 = arith.mulf %80, %20 : vector<2x32xf32>
      %90 = arith.addf %88, %89 : vector<2x32xf32>
      %c0_44 = arith.constant 0 : index
      %c0_45 = arith.constant 0 : index
      %91 = vector.load %arg12[%c0_44, %c0_45] : memref<2x32xf32, #tpu.memory_space<vmem>>, vector<2x32xf32>
      tpu.vector_store %arg12[%c0_44, %c0_45], %64 {strides = array<i32>} : memref<2x32xf32, #tpu.memory_space<vmem>>, vector<2x32xf32>,
      %c0_46 = arith.constant 0 : index
      %c0_47 = arith.constant 0 : index
      %92 = vector.load %arg13[%c0_46, %c0_47] : memref<2x32xf32, #tpu.memory_space<vmem>>, vector<2x32xf32>
      tpu.vector_store %arg13[%c0_46, %c0_47], %90 {strides = array<i32>} : memref<2x32xf32, #tpu.memory_space<vmem>>, vector<2x32xf32>,
      %93 = arith.index_cast %arg14 : i32 to index
      %c0_48 = arith.constant 0 : index
      %c0_49 = arith.constant 0 : index
      %94 = vector.load %arg9[%93, %c0_48, %c0_49] : memref<8x2x64xf32, #tpu.memory_space<vmem>>, vector<1x2x32xf32>
      %95 = vector.shape_cast %94 : vector<1x2x32xf32> to vector<2x32xf32>
      %96 = vector.shape_cast %64 : vector<2x32xf32> to vector<1x2x32xf32>
      tpu.vector_store %arg9[%93, %c0_48, %c0_49], %96 {strides = array<i32>} : memref<8x2x64xf32, #tpu.memory_space<vmem>>, vector<1x2x32xf32>,
      %97 = arith.index_cast %18 : i32 to index
      %c0_50 = arith.constant 0 : index
      %c32 = arith.constant 32 : index
      %98 = vector.load %arg9[%97, %c0_50, %c32] : memref<8x2x64xf32, #tpu.memory_space<vmem>>, vector<1x2x32xf32>
      %99 = vector.shape_cast %98 : vector<1x2x32xf32> to vector<2x32xf32>
      %100 = vector.shape_cast %90 : vector<2x32xf32> to vector<1x2x32xf32>
      tpu.vector_store %arg9[%97, %c0_50, %c32], %100 {strides = array<i32>} : memref<8x2x64xf32, #tpu.memory_space<vmem>>, vector<1x2x32xf32>,
    }
    %c8_i32_20 = arith.constant 8 : i32
    return
  }
}

</mosaic_0001>

<bundles_post_ra>
// kernel: tpu_custom_call.1
= control target key start
LH: loop header
LB: loop body
LE: loop exit
PB: predicated region body
PF: predicated region fallthrough
CT: control target
= control target key end

     0   :  { %14 = vsyncpa [#allocation7], 0  ;;  %s1009_s0 = inlined_call_operand.hbm [shape: f32[16,16], index: 0, kind: input, shape index: {}]   ;;  %s1010_s1 = inlined_call_operand.hbm [shape: f32[16,96], index: 1, kind: input, shape index: {}]   ;;  %s1011_s2 = inlined_call_operand.hbm [shape: f32[32,96], index: 2, kind: input, shape index: {}]   ;;  %s1012_s3 = inlined_call_operand.vmem [shape: f32[1,96], index: 3, kind: input, shape index: {}]   ;;  %s1013_s4 = inlined_call_operand.vmem [shape: f32[1,96], index: 4, kind: input, shape index: {}]   ;;  %s1014_s5 = inlined_call_operand.vmem [shape: f32[16,96], index: 5, kind: input, shape index: {}]   ;;  %s1015_s6 = inlined_call_operand.hbm [shape: f32[32,96], index: 6, kind: input, shape index: {}]   ;;  %s1016_s7 = inlined_call_operand.vmem [shape: f32[1,96], index: 7, kind: input, shape index: {}]   ;;  %s1017_s8 = inlined_call_operand.vmem [shape: f32[1,96], index: 8, kind: input, shape index: {}]   ;;  %s1018_s9 = inlined_call_operand.hbm [shape: f32[8,2,64], index: 9, kind: output, shape index: {}]  }
   0x1   :  { %15 = vsyncpa [#allocation10], 0 }
   0x2   :  { %16 = vsyncpa [#allocation13], 0 }
   0x3   :  { %17 = vsyncpa [#allocation8], 0  ;;  %s812_s30 = smov [#allocation9]   ;;  %s813_s11 = smov [#allocation6]  }
   0x4   :  { %s35_s10 = sshll.u32 %s812_s30, 4  ;;  %s23_s12 = sshll.u32 %s813_s11, 4  ;;  %s36_s10 = int_to_ptr.vmem [resolvable:$true] %s35_s10  ;;  %s878_s12 = int_to_ptr.vmem [resolvable:$true] %s23_s12 }
   0x5   :  { %s686_s15 = scalar_lea.hbm %s1010_s1, 256 }
   0x6   :  { %p687_p0 = scmp.ne.s32.totalorder %s1010_s1, %s686_s15  ;;  %p690_p1 = scmp.lt.u32.totalorder %s686_s15, %s1010_s1 }
   0x8   :  { %p692_p2 = pnand %p690_p1, %p687_p0 }
   0xa   :  { %695 = shalt.err (!%p692_p2)
}
   0xb   :  { %s696_s20 = scalar_lea.vmem %s36_s10, 256  ;;  %p701_p4 = scmp.lt.s32.totalorder %s36_s10, %s36_s10 }
   0xc   :  { %p697_p3 = scmp.ne.s32.totalorder %s36_s10, %s696_s20  ;;  %p702_p5 = scmp.lt.s32.totalorder %s696_s20, %s696_s20 }
   0xe   :  { %p703_p6 = por %p702_p5, %p701_p4 }
  0x10   :  { %p704_p7 = pnand %p703_p6, %p697_p3 }
  0x12   :  { %707 = shalt.err (!%p704_p7)
}
  0x13   :  { %s814_s21 = smov 128   ;;  %s815_s22 = smov 8  }
  0x14   :  { %41 = dma.hbm_to_vmem [thread:$0]  %s1010_s1, 256, %s36_s10, [#allocation10], %s814_s21, %s814_s21, %s815_s22  }
  0x15   :  { %s708_s27 = scalar_lea.hbm %s1009_s0, 256 }
  0x16   :  { %p709_p8 = scmp.ne.s32.totalorder %s1009_s0, %s708_s27  ;;  %p712_p9 = scmp.lt.u32.totalorder %s708_s27, %s1009_s0 }
  0x18   :  { %p714_p10 = pnand %p712_p9, %p709_p8 }
  0x1a   :  { %717 = shalt.err (!%p714_p10)
}
  0x1b   :  { %s718_s13 = scalar_lea.vmem %s878_s12, 256  ;;  %p723_p12 = scmp.lt.s32.totalorder %s878_s12, %s878_s12 }
  0x1c   :  { %p719_p11 = scmp.ne.s32.totalorder %s878_s12, %s718_s13  ;;  %p724_p13 = scmp.lt.s32.totalorder %s718_s13, %s718_s13 }
  0x1e   :  { %p725_p0 = por %p724_p13, %p723_p12 }
  0x20   :  { %p726_p1 = pnand %p725_p0, %p719_p11 }
  0x22   :  { %729 = shalt.err (!%p726_p1)
}
  0x23   :  { %29 = dma.hbm_to_vmem [thread:$0]  %s1009_s0, 256, %s878_s12, [#allocation7], %s814_s21, %s814_s21, %s815_s22  }
  0x24   :  { %s816_s14 = smov [#allocation11]   ;;  %s817_s16 = smov [#allocation12]  }
  0x25   :  { %s47_s15 = sshll.u32 %s816_s14, 4  ;;  %s65_s17 = sshll.u32 %s817_s16, 4  ;;  %s48_s15 = int_to_ptr.vmem [resolvable:$true] %s47_s15  ;;  %s915_s17 = int_to_ptr.vmem [resolvable:$true] %s65_s17 }
  0x26   :  { %s730_s20 = scalar_lea.hbm %s1011_s2, 512 }
  0x27   :  { %p731_p2 = scmp.ne.s32.totalorder %s1011_s2, %s730_s20  ;;  %p734_p3 = scmp.lt.u32.totalorder %s730_s20, %s1011_s2 }
  0x29   :  { %p736_p4 = pnand %p734_p3, %p731_p2 }
  0x2b   :  { %739 = shalt.err (!%p736_p4)
}
  0x2c   :  { %s740_s0 = scalar_lea.vmem %s48_s15, 512  ;;  %p745_p6 = scmp.lt.s32.totalorder %s48_s15, %s48_s15 }
  0x2d   :  { %p741_p5 = scmp.ne.s32.totalorder %s48_s15, %s740_s0  ;;  %p746_p7 = scmp.lt.s32.totalorder %s740_s0, %s740_s0 }
  0x2f   :  { %p747_p8 = por %p746_p7, %p745_p6 }
  0x31   :  { %p748_p9 = pnand %p747_p8, %p741_p5 }
  0x33   :  { %751 = shalt.err (!%p748_p9)
}
  0x34   :  { %53 = dma.hbm_to_vmem [thread:$0]  %s1011_s2, 512, %s48_s15, [#allocation10], %s814_s21, %s814_s21, %s815_s22  }
  0x35   :  { %s752_s30 = scalar_lea.hbm %s1015_s6, 512 }
  0x36   :  { %p753_p10 = scmp.ne.s32.totalorder %s1015_s6, %s752_s30  ;;  %p756_p11 = scmp.lt.u32.totalorder %s752_s30, %s1015_s6 }
  0x38   :  { %p758_p12 = pnand %p756_p11, %p753_p10 }
  0x3a   :  { %761 = shalt.err (!%p758_p12)
}
  0x3b   :  { %s762_s14 = scalar_lea.vmem %s915_s17, 512  ;;  %p767_p0 = scmp.lt.s32.totalorder %s915_s17, %s915_s17 }
  0x3c   :  { %p763_p13 = scmp.ne.s32.totalorder %s915_s17, %s762_s14  ;;  %p768_p1 = scmp.lt.s32.totalorder %s762_s14, %s762_s14 }
  0x3e   :  { %p769_p2 = por %p768_p1, %p767_p0 }
  0x40   :  { %p770_p3 = pnand %p769_p2, %p763_p13 }
  0x42   :  { %773 = shalt.err (!%p770_p3)
}
  0x43   :  { %71 = dma.hbm_to_vmem [thread:$0]  %s1015_s6, 512, %s915_s17, [#allocation13], %s814_s21, %s814_s21, %s815_s22  }
  0x44   :  { %800 = dma.done.wait [#allocation7], 256  }
  0x45   :  { %801 = vsyncadd [#allocation7], 4294967040 }
  0x46   :  { %802 = dma.done.wait [#allocation10], 768  }
  0x47   :  { %803 = vsyncadd [#allocation10], 4294966528 }
  0x48   :  { %804 = dma.done.wait [#allocation13], 512  }
  0x49   :  { %805 = vsyncadd [#allocation13], 4294966784  ;;  %vm270_vm0 = vcmask 254976   ;;  %v818_v0 = vmov 0.0   ;;  %vm99_vm1 = vcmask 130048   ;;  %v90_v1 = vld [vmem:[#allocation9] sm:$0xff] }
  0x4a   :  { %271 = vst.msk [vmem:[#allocation4] sm:$0x3] %vm270_vm0, %v818_v0  ;;  %272 = vst.msk [vmem:[#allocation5] sm:$0x3] %vm270_vm0, %v818_v0  ;;  %v91_v2 = vld [vmem:[#allocation9 + $0x8] sm:$0xff]  ;;  %v185_v5 = vld [vmem:[%s1014_s5 + $0x8] sm:$0xff] }
  0x4b   :  { %v184_v3 = vld [vmem:[%s1014_s5] sm:$0xff]  ;;  %v630_v4 = vpack.c.bf16 %v91_v2, %v90_v1  ;;  %v89_v8 = vld [vmem:[#allocation6 + $0x8] sm:$0xff]  ;;  %vm181_vm2 = vcmask 785408   ;;  %s970_s20 = smov 0  }
  0x4c   :  { %v88_v6 = vld [vmem:[#allocation6] sm:$0xff]  ;;  %v634_v7 = vpack.c.bf16 %v185_v5, %v184_v3  ;;  %v562_v9 = vld [vmem:[%s1012_s3] ss:$0 sm:$0xff] }
  0x4d   :  { %598 = vmatprep.mubr.msk.f32.mxu0 %vm99_vm1, %v88_v6  ;;  %605 = vmatprep.mubr.msk.f32.mxu1 %vm99_vm1, %v88_v6  ;;  %v565_v10 = vld [vmem:[%s1016_s7] ss:$0 sm:$0xff] }
  0x4e   :  { %631 = vmatprep.subr.bf16.mxu0 %v630_v4  ;;  %635 = vmatprep.subr.bf16.mxu1 %v634_v7 }
  0x4f   :  { %633 = vmatpush3.bf16.msra.mxu0 %v630_v4  ;;  %637 = vmatpush3.bf16.msra.mxu1 %v634_v7 }
  0x52   :  { %599 = vmatmul.mubr.msk.f32.vlgmr.msra.gmra.mrb[0].mxu0 %vm99_vm1, %v89_v8  ;;  %606 = vmatmul.mubr.msk.f32.vlgmr.msra.gmra.mrb[0].mxu1 %vm99_vm1, %v89_v8 }
 0x125   :  { %v600_v11 = vpop.f32.mrb[0].mxu0  ;;  %v607_v13 = vpop.f32.mrb[0].mxu1 }
 0x126   :  { %v178_v12 = vadd.f32 %v600_v11, %v562_v9  ;;  %v172_v14 = vpop.f32.mrb[1].mxu0  ;;  %v265_v15 = vadd.f32 %v607_v13, %v565_v10  ;;  %v259_v17 = vpop.f32.mrb[1].mxu1 }
 0x127   :  { %v173_v16 = vadd.f32 %v562_v9, %v172_v14  ;;  %v260_v18 = vadd.f32 %v565_v10, %v259_v17 }
 0x128   :  { %183 = vst.msk [vmem:[#allocation2 + $0x8] sm:$0xff] %vm181_vm2, %v178_v12  ;;  %269 = vst.msk [vmem:[#allocation3 + $0x8] sm:$0xff] %vm181_vm2, %v265_v15 }
 0x129   :  { %182 = vst.msk [vmem:[#allocation2] sm:$0xff] %vm181_vm2, %v173_v16  ;;  %268 = vst.msk [vmem:[#allocation3] sm:$0xff] %vm181_vm2, %v260_v18 }
 0x12a LB: > { %v288_v19 = vld [vmem:[#allocation11] sm:$0xff]  ;;  %v289_v20 = vld [vmem:[#allocation11 + $0x8] sm:$0xff]  ;;  %v819_v22 = vmov 0.0|0.0   ;;  %v290_v25 = vld [vmem:[#allocation11 + $0x10] sm:$0xff]  ;;  %vm820_vm3 = vmmov 0   ;;  %v821_v28 = vmov 0.0   ;;  %s810_s20 = sphi %s970_s20, %s278_s20  }
 0x12b   : > { %v373_v21 = vld [vmem:[#allocation12] sm:$0xff]  ;;  %638 = vmatprep.subr.bf16.mxu0 %v819_v22  ;;  %v639_v23 = vpack.c.bf16 %v289_v20, %v288_v19  ;;  %644 = vmatprep.subr.bf16.mxu1 %v819_v22  ;;  %v374_v24 = vld [vmem:[#allocation12 + $0x8] sm:$0xff]  ;;  %v291_v26 = vld [vmem:[#allocation11 + $0x18] sm:$0xff]  ;;  %vm299_vm4 = vcmask 261120   ;;  %s822_s25 = smov 64   ;;  %s568_s26 = sshll.u32 %s810_s20, 1 }
 0x12c   : > { %v645_v27 = vpack.c.bf16 %v374_v24, %v373_v21  ;;  %616 = vmatprep.mubr.msk.f32.mxu0 %vm820_vm3, %v821_v28  ;;  %v375_v29 = vld [vmem:[#allocation12 + $0x10] sm:$0xff]  ;;  %v376_v30 = vld [vmem:[#allocation12 + $0x18] sm:$0xff]  ;;  %627 = vmatprep.mubr.msk.f32.mxu1 %vm820_vm3, %v821_v28  ;;  %v642_v31 = vpack.c.bf16 %v291_v26, %v290_v25  ;;  %s279_s0 = ssub.s32 7, %s810_s20  ;;  %s283_s27 = scalar_lea.vmem [#allocation2], %s568_s26  ;;  %vm528_vm5 = vcmask 517376  }
 0x12d   : > { %640 = vmatpush3.bf16.msra.mxu0 %v639_v23  ;;  %v648_v32 = vpack.c.bf16 %v376_v30, %v375_v29  ;;  %v280_v33 = vld [vmem:[#allocation4] sm:$0x3]  ;;  %v281_v34 = vld [vmem:[#allocation5] sm:$0x3]  ;;  %s983_s12 = sshll.u32 %s279_s0, 1  ;;  %s823_s29 = smov 32  }
 0x12e   : > { %641 = vmatprep.subr.bf16.mxu0 %v819_v22  ;;  %646 = vmatpush3.bf16.msra.mxu1 %v645_v27  ;;  %v570_v35 = vld [vmem:[%s1013_s4] ss:$0 sm:$0xff]  ;;  %s286_s28 = scalar_lea.vmem [#allocation3], %s983_s12  ;;  %s824_s30 = smov 96  }
 0x12f   : > { %647 = vmatprep.subr.bf16.mxu1 %v819_v22  ;;  %v572_v37 = vld [vmem:[%s1017_s8] ss:$0 sm:$0xff]  ;;  %s525_s11 = scalar_lea.vmem [#allocation14], %s568_s26  ;;  %s527_s13 = scalar_lea.vmem [#allocation14], %s983_s12 }
 0x130   : > { %v284_v43 = vld [vmem:[%s283_s27] sm:$0x3]  ;;  %s278_s20 = sadd.s32 1, %s810_s20  }
 0x131   : > { %643 = vmatpush3.bf16.msra.mxu0 %v642_v31  ;;  %v287_v45 = vld [vmem:[%s286_s28] sm:$0x3]  ;;  %p275_p4 = scmp.ge.s32.totalorder %s278_s20, 8  }
 0x132   : > { %649 = vmatpush3.bf16.msra.mxu1 %v648_v32  ;;  %s825_s1 = smov (%p275_p4), [#allocation14]  }
 0x133   :  { %s535_s10 = sshll.u32 (%p275_p4), %s825_s1, 4  ;;  %s536_s10 = int_to_ptr.vmem [resolvable:$true] %s535_s10 }
 0x134   : > { %617 = vmatmul.mubr.msk.f32.vlgmr.msra.gmra.mrb[0].mxu0 %vm299_vm4, %v280_v33  ;;  %s774_s14 = scalar_lea.vmem (%p275_p4), %s536_s10, 256  ;;  %p779_p6 = scmp.lt.s32.totalorder (%p275_p4), %s536_s10, %s536_s10 }
 0x135   : > { %628 = vmatmul.mubr.msk.f32.vlgmr.msra.gmra.mrb[0].mxu1 %vm299_vm4, %v281_v34  ;;  %p775_p5 = scmp.ne.s32.totalorder (%p275_p4), %s536_s10, %s774_s14  ;;  %p780_p7 = scmp.lt.s32.totalorder (%p275_p4), %s774_s14, %s774_s14 }
 0x137   :  { %p781_p8 = por (%p275_p4), %p780_p7, %p779_p6 }
 0x139   :  { %p782_p9 = pnand (%p275_p4), %p781_p8, %p775_p5 }
 0x207   : > { %v369_v36 = vpop.f32.mrb[0].mxu0 }
 0x208   : > { %v370_v38 = vadd.f32 %v570_v35, %v369_v36  ;;  %v618_v39 = vpop.f32.mrb[1].mxu0  ;;  %v453_v40 = vpop.f32.mrb[0].mxu1 }
 0x209   : > { %v629_v41 = vpop.f32.mrb[1].mxu1  ;;  %v454_v42 = vadd.f32 %v572_v37, %v453_v40 }
 0x20a   : > { %465 = vrot.lane.b32.xlu0 %v370_v38, %s822_s25  ;;  %v457_v44 = vadd.f32 %v370_v38, %v284_v43 }
 0x20b   : > { %v486_v47 = vadd.f32 %v454_v42, %v287_v45 }
 0x20c   : > { %v574_v46 = vmul.f32 -1.442695, %v457_v44 }
 0x20d   : > { %v575_v48 = vmul.f32 -1.442695, %v486_v47 }
 0x20e   : > { %494 = vrot.lane.b32.xlu0 %v454_v42, %s822_s25  ;;  %674 = vpow2.f32 %v574_v46 }
 0x20f   : > { %676 = vpow2.f32 %v575_v48 }
 0x218   : > { %v675_v49 = vpop.eup %674 }
 0x219   : > { %v461_v50 = vadd.f32 1.0, %v675_v49  ;;  %v677_v51 = vpop.eup %676 }
 0x21a   : > { %v490_v52 = vadd.f32 1.0, %v677_v51 }
 0x21b   : > { %678 = vrcp.f32 %v461_v50 }
 0x21c   : > { %680 = vrcp.f32 %v490_v52 }
 0x225   : > { %v679_v53 = vpop.eup %678 }
 0x226   : > { %v681_v56 = vpop.eup %680  ;;  %v475_v2 = vsub.f32 1.0, %v679_v53 }
 0x227   : > { %v504_v8 = vsub.f32 1.0, %v681_v56 }
 0x27c   : > { %v466_v54 = vpop.permute.xlu0 %465 }
 0x27d   : > { %v468_v55 = vmul.f32 %v679_v53, %v466_v54 }
 0x27f   : > { %470 = vrot.lane.b32.xlu1 %v468_v55, %s822_s25 }
 0x280   : > { %v495_v57 = vpop.permute.xlu0 %494 }
 0x281   : > { %v497_v58 = vmul.f32 %v681_v56, %v495_v57 }
 0x283   : > { %499 = vrot.lane.b32.xlu1 %v497_v58, %s822_s25 }
 0x287   : > { %481 = vrot.lane.b32.xlu1 %v280_v33, %s823_s29 }
 0x28b   : > { %510 = vrot.lane.b32.xlu1 %v281_v34, %s823_s29 }
 0x2f1   : > { %v471_v59 = vpop.permute.xlu1 %470 }
 0x2f2   : > { %v473_v60 = vadd.f32 %v471_v59, %v284_v43 }
 0x2f4   : > { %682 = vtanh.f32 %v473_v60 }
 0x2f5   : > { %v500_v61 = vpop.permute.xlu1 %499 }
 0x2f6   : > { %v502_v62 = vadd.f32 %v500_v61, %v287_v45 }
 0x2f8   : > { %684 = vtanh.f32 %v502_v62 }
 0x2f9   : > { %v482_v1 = vpop.permute.xlu1 %481 }
 0x2fa   : > { %v484_v4 = vmul.f32 %v679_v53, %v482_v1 }
 0x2fd   : > { %v511_v6 = vpop.permute.xlu1 %510 }
 0x2fe   : > { %v683_v63 = vpop.eup %682  ;;  %v513_v10 = vmul.f32 %v681_v56, %v511_v6 }
 0x2ff   : > { %477 = vrot.lane.b32.xlu0 %v683_v63, %s824_s30 }
 0x302   : > { %v685_v0 = vpop.eup %684 }
 0x303   : > { %506 = vrot.lane.b32.xlu0 %v685_v0, %s824_s30 }
 0x371   : > { %v478_v3 = vpop.permute.xlu0 %477 }
 0x372   : > { %v480_v5 = vmul.f32 %v478_v3, %v475_v2 }
 0x374   : > { %v485_v7 = vadd.f32 %v484_v4, %v480_v5 }
 0x375   : > { %v507_v9 = vpop.permute.xlu0 %506 }
 0x376   : > { %v509_v11 = vmul.f32 %v507_v9, %v504_v8  ;;  %516 = vrot.lane.b32.xlu0 %v485_v7, %s824_s30 }
 0x378   : > { %v514_v12 = vadd.f32 %v513_v10, %v509_v11 }
 0x37a   : > { %521 = vrot.lane.b32.xlu1 %v514_v12, %s824_s30 }
 0x3e7   :  { %277 = sbr.rel (!%p275_p4) target bundleno = 298 (0x12a), region = 83 }
 0x3e8   : > { %v517_v13 = vpop.permute.xlu0 %516 }
 0x3e9   : > { %519 = vst.msk [vmem:[#allocation4] sm:$0x3] %vm270_vm0, %v517_v13  ;;  %526 = vst.msk [vmem:[%s525_s11] sm:$0x3] %vm270_vm0, %v517_v13 }
 0x3ea   : > { %529 = vst.msk [vmem:[%s527_s13] sm:$0x3] %vm528_vm5, %v514_v12 }
 0x3ec   : > { %v522_v14 = vpop.permute.xlu1 %521 }
 0x3ed   : > { %524 = vst.msk [vmem:[#allocation5] sm:$0x3] %vm270_vm0, %v522_v14 }
 0x3ee   :  { %785 = shalt.err (!%p782_p9)
}
 0x3ef   :  { %s786_s16 = scalar_lea.hbm %s1018_s9, 256 }
 0x3f0   :  { %p787_p10 = scmp.ne.s32.totalorder %s1018_s9, %s786_s16  ;;  %p790_p11 = scmp.lt.u32.totalorder %s786_s16, %s1018_s9 }
 0x3f2   :  { %p792_p12 = pnand %p790_p11, %p787_p10 }
 0x3f4   :  { %795 = shalt.err (!%p792_p12)
}
 0x3f5   :  { %s826_s4 = smov 32   ;;  %s827_s8 = smov 2  }
 0x3f6   :  { %541 = dma.vmem_to_hbm [thread:$0]  %s536_s10, 256, %s1018_s9, [#allocation8], %s826_s4, %s826_s4, %s827_s8  }
 0x3f7   :  { %806 = dma.done.wait [#allocation8], 256  }
 0x3f8   :  { %807 = vsyncadd [#allocation8], 4294967040 }
 0x3f9   :  { %545 = vsyncpa [#allocation7], 1 }
 0x3fa   :  { %546 = vsyncpa [#allocation10], 1 }
 0x3fb   :  { %547 = vsyncpa [#allocation13], 1 }
 0x3fc   :  { %548 = vsyncpa [#allocation8], 1 }

</bundles_post_ra>
